<compile_context>
chip_gen: v7x
topology: tpu7x:2x2x1
jax: 0.10.0
libtpu: 0.0.40
codegen_flags: <defaults>
</compile_context>

<pallas_src>
import functools

import jax
import jax.numpy as jnp
import numpy as np
from jax.experimental import pallas as pl
from jax.experimental.pallas import tpu as pltpu


def _rope_kernel(x_ref, trig_ref, o_ref, *, n_h, h_d):
    """x_ref/o_ref: (1, ts, n_h*h_d) in x.dtype; trig_ref: (1, 3, ts, h_d) f32.

    trig rows: [cos (duplicated per interleaved pair),
                sin_even = -sin on even lanes / 0 on odd lanes,
                sin_odd  = +sin on odd  lanes / 0 on even lanes].
    """
    x = x_ref[0, :, :].astype(jnp.float32)            # (ts, n_h*h_d)
    w = n_h * h_d

    # Adjacent-lane neighbours for the interleaved pairs. Rolling across head
    # (or wrap-around) boundaries is harmless: the contaminated lanes are
    # exactly the ones where the masked sin tables are zero.
    up = jnp.roll(x, shift=w - 1, axis=1)              # up[j] = x[(j + 1) % w]
    dn = jnp.roll(x, shift=1, axis=1)                  # dn[j] = x[(j - 1) % w]

    cos = trig_ref[0, 0, :, :]                         # (ts, h_d)
    sin_e = trig_ref[0, 1, :, :]                       # -sin on even lanes, 0 on odd
    sin_o = trig_ref[0, 2, :, :]                       # +sin on odd  lanes, 0 on even

    # Static unroll over heads: every slice is a clean h_d-lane window, so the
    # small (ts, h_d) trig tables broadcast over heads with no replication.
    for h in range(n_h):
        sl = slice(h * h_d, (h + 1) * h_d)
        o_ref[0, :, sl] = (
            x[:, sl] * cos + up[:, sl] * sin_e + dn[:, sl] * sin_o
        ).astype(o_ref.dtype)


def _choose_seq_tile(b, s, n_h, h_d, itemsize):
    """Pick the sequence-tile length (rows of the x block)."""
    sub = 8 * max(1, 4 // itemsize)        # native sublane tile: 8 f32 / 16 bf16 / 32 i8
    # ~2 MiB of x (native dtype) per block; with double-buffered in/out plus the
    # in-kernel f32 copies (x, up, dn) that is ~16-24 MiB resident, well inside
    # the explicit 48 MiB VMEM limit on every generation.
    target_bytes = 2 << 20
    row_bytes = max(1, n_h * h_d * itemsize)
    ts = max(sub, (target_bytes // row_bytes) // sub * sub)
    if ts >= s:
        ts = s
        # v7x has two TensorCores per chip: for single-batch inputs keep at
        # least two parallel sequence tiles when the sequence can be split.
        if b == 1 and s >= 2 * sub:
            half = (((s + 1) // 2) + sub - 1) // sub * sub
            if half < s:
                ts = half
    return ts


def _rope_pallas(x3, trig, *, n_h, h_d):
    """x3: (b, s, n_h*h_d); trig: (pb, 3, s, h_d) f32 with pb in {1, b}."""
    b, s, w = x3.shape
    pb = trig.shape[0]
    if pb not in (1, b):
        raise ValueError(f"trig batch {pb} incompatible with x batch {b}")

    ts = _choose_seq_tile(b, s, n_h, h_d, x3.dtype.itemsize)
    # Batch is the innermost grid axis so the shared (pb == 1) trig block keeps
    # the same block index on consecutive steps and is not re-fetched per batch.
    grid = (pl.cdiv(s, ts), b)

    x_spec = pl.BlockSpec((1, ts, w), lambda j, i: (i, j, 0))
    if pb == 1:
        trig_spec = pl.BlockSpec((1, 3, ts, h_d), lambda j, i: (0, 0, j, 0))
    else:
        trig_spec = pl.BlockSpec((1, 3, ts, h_d), lambda j, i: (i, 0, j, 0))

    return pl.pallas_call(
        functools.partial(_rope_kernel, n_h=n_h, h_d=h_d),
        grid=grid,
        in_specs=[x_spec, trig_spec],
        out_specs=x_spec,
        out_shape=jax.ShapeDtypeStruct((b, s, w), x3.dtype),
        compiler_params=pltpu.CompilerParams(
            dimension_semantics=("parallel", "parallel"),
            vmem_limit_bytes=48 << 20,
        ),
    )(x3, trig)


class RoPE:
    """JAX/Pallas port of the torchtune-style interleaved RoPE module."""

    def __init__(self, dim: int, max_seq_len: int, base: int = 10000):
        self.dim = dim
        self.base = base
        self.max_seq_len = max_seq_len
        self._rope_init()

    def reset_parameters(self):
        self._rope_init()

    def _rope_init(self):
        half = self.dim // 2
        self.theta = 1.0 / (
            self.base
            ** (jnp.arange(0, self.dim, 2)[:half].astype(jnp.float32) / self.dim)
        )
        self.build_rope_cache(self.max_seq_len)

    def build_rope_cache(self, max_seq_len: int):
        seq_idx = jnp.arange(max_seq_len, dtype=jnp.float32)
        idx_theta = seq_idx[:, None] * self.theta[None, :]          # [S, dim//2]
        cos = jnp.cos(idx_theta)
        sin = jnp.sin(idx_theta)
        # Plain caches (parity with the PyTorch `cache` buffer; used by the ref).
        self.cos_cache = cos
        self.sin_cache = sin
        # Fused, lane-dense, pre-masked trig table consumed by the kernel:
        #   trig[0, p, 2k] = trig[0, p, 2k+1] = cos(p*theta_k)
        #   trig[1, p, 2k] = -sin(p*theta_k) ; trig[1, p, 2k+1] = 0
        #   trig[2, p, 2k] = 0               ; trig[2, p, 2k+1] = +sin(p*theta_k)
        zeros = jnp.zeros_like(sin)
        cos_i = jnp.stack([cos, cos], axis=-1).reshape(max_seq_len, self.dim)
        sin_e = jnp.stack([-sin, zeros], axis=-1).reshape(max_seq_len, self.dim)
        sin_o = jnp.stack([zeros, sin], axis=-1).reshape(max_seq_len, self.dim)
        self.trig = jnp.stack([cos_i, sin_e, sin_o], axis=0)        # [3, S, dim]

    def __call__(self, x, *, input_pos=None):
        b, s, n_h, h_d = x.shape
        if h_d != self.dim:
            raise ValueError(f"head dim {h_d} != RoPE dim {self.dim}")
        if s > self.max_seq_len:
            # Matches the PyTorch module: rebuild the cache for longer sequences.
            # Host-side Python state mutation — not safe under jax.jit (retraces).
            self.max_seq_len = s
            self.build_rope_cache(s)

        if input_pos is None:
            trig = self.trig[:, :s][None]               # (1, 3, s, h_d), shared over batch
        else:
            # TODO(synk): drive the trig index_map from scalar-prefetched positions
            # (PrefetchScalarGridSpec) instead of this host-side XLA gather.
            pos = jnp.asarray(input_pos)
            if pos.ndim == 1:
                pos = pos[None, :]                      # accept [s] as well as [b, s]
            trig = jnp.swapaxes(self.trig[:, pos], 0, 1)  # (pb, 3, s, h_d)

        x3 = x.reshape(b, s, n_h * h_d)                 # contiguous -> free reshape
        out = _rope_pallas(x3, trig, n_h=n_h, h_d=h_d)
        return out.reshape(b, s, n_h, h_d)


def _rope_reference(x, cos_cache, sin_cache):
    """Pure-JAX reference mirroring the PyTorch forward (default positions)."""
    b, s, n_h, h_d = x.shape
    xf = x.astype(jnp.float32).reshape(b, s, n_h, h_d // 2, 2)
    cos = cos_cache[:s][None, :, None, :]
    sin = sin_cache[:s][None, :, None, :]
    out = jnp.stack(
        [
            xf[..., 0] * cos - xf[..., 1] * sin,
            xf[..., 1] * cos + xf[..., 0] * sin,
        ],
        axis=-1,
    ).reshape(b, s, n_h, h_d)
    return out.astype(x.dtype)


if __name__ == "__main__":
    # small shapes: batch=2, seq=8, n_heads=4, head_dim=128 (typical RoPE head dim)
    b, s, n_h, h_d = 2, 8, 4, 128
    max_seq_len = 16

    root = jax.random.PRNGKey(0)
    k0, k1 = jax.random.split(root)
    x = jax.random.normal(k0, (b, s, n_h, h_d), dtype=jnp.float32)

    rope = RoPE(dim=h_d, max_seq_len=max_seq_len)

    out = jax.block_until_ready(rope(x))
    ref = _rope_reference(x, rope.cos_cache, rope.sin_cache)
    np.testing.assert_allclose(np.asarray(out), np.asarray(ref), rtol=1e-5, atol=1e-5)
    assert out.shape == x.shape and out.dtype == x.dtype

    # input_pos path (batched trig gather) must reproduce the default positions.
    pos = jnp.broadcast_to(jnp.arange(s, dtype=jnp.int32)[None, :], (b, s))
    out_pos = jax.block_until_ready(rope(x, input_pos=pos))
    np.testing.assert_allclose(np.asarray(out_pos), np.asarray(ref), rtol=1e-5, atol=1e-5)

    # Single-batch bf16 input with a longer sequence: exercises the cache
    # rebuild, the bf16 upcast/downcast path and the >=2 parallel seq tiles
    # (v7x megacore) split.
    x1 = jax.random.normal(k1, (1, 32, n_h, h_d), dtype=jnp.bfloat16)
    out1 = jax.block_until_ready(rope(x1))
    ref1 = _rope_reference(x1, rope.cos_cache, rope.sin_cache)
    np.testing.assert_allclose(
        np.asarray(out1.astype(jnp.float32)),
        np.asarray(ref1.astype(jnp.float32)),
        rtol=5e-2,
        atol=5e-2,
    )
    assert out1.shape == x1.shape and out1.dtype == x1.dtype

    print("KERNEL_OK")
</pallas_src>

<mosaic_0001>
module attributes {stable_mosaic.version = 11 : i64} {
  func.func @_rope_kernel(%arg0: i32, %arg1: i32, %arg2: memref<1x8x512xf32, #tpu.memory_space<vmem>>, %arg3: memref<1x3x8x128xf32, #tpu.memory_space<vmem>>, %arg4: memref<1x8x512xf32, #tpu.memory_space<vmem>>) attributes {dimension_semantics = [#tpu.dimension_semantics<parallel>, #tpu.dimension_semantics<parallel>], iteration_bounds = array<i64: 1, 2>, scalar_prefetch = 0 : i64, scratch_operands = 0 : i64, tpu.core_type = #tpu.core_type<tc>, window_params = [{transform_indices = @transform_0, window_bounds = array<i64: 1, 8, 512>}, {transform_indices = @transform_1, window_bounds = array<i64: 1, 3, 8, 128>}, {transform_indices = @transform_2, window_bounds = array<i64: 1, 8, 512>}]} {
    %c0 = arith.constant 0 : index
    %c0_0 = arith.constant 0 : index
    %c0_1 = arith.constant 0 : index
    %0 = vector.load %arg2[%c0, %c0_0, %c0_1] : memref<1x8x512xf32, #tpu.memory_space<vmem>>, vector<1x8x512xf32>
    %1 = vector.shape_cast %0 : vector<1x8x512xf32> to vector<8x512xf32>
    %2 = vector.extract_strided_slice %1 {offsets = [0, 1], sizes = [8, 511], strides = [1, 1]} : vector<8x512xf32> to vector<8x511xf32>
    %3 = vector.extract_strided_slice %1 {offsets = [0, 0], sizes = [8, 1], strides = [1, 1]} : vector<8x512xf32> to vector<8x1xf32>
    %4 = tpu.concatenate %2, %3 in 1 : vector<8x511xf32>, vector<8x1xf32> -> vector<8x512xf32>
    %5 = vector.extract_strided_slice %1 {offsets = [0, 511], sizes = [8, 1], strides = [1, 1]} : vector<8x512xf32> to vector<8x1xf32>
    %6 = vector.extract_strided_slice %1 {offsets = [0, 0], sizes = [8, 511], strides = [1, 1]} : vector<8x512xf32> to vector<8x511xf32>
    %7 = tpu.concatenate %5, %6 in 1 : vector<8x1xf32>, vector<8x511xf32> -> vector<8x512xf32>
    %c0_2 = arith.constant 0 : index
    %c0_3 = arith.constant 0 : index
    %c0_4 = arith.constant 0 : index
    %c0_5 = arith.constant 0 : index
    %8 = vector.load %arg3[%c0_2, %c0_3, %c0_4, %c0_5] : memref<1x3x8x128xf32, #tpu.memory_space<vmem>>, vector<1x1x8x128xf32>
    %9 = vector.shape_cast %8 : vector<1x1x8x128xf32> to vector<8x128xf32>
    %c0_6 = arith.constant 0 : index
    %c1 = arith.constant 1 : index
    %c0_7 = arith.constant 0 : index
    %c0_8 = arith.constant 0 : index
    %10 = vector.load %arg3[%c0_6, %c1, %c0_7, %c0_8] : memref<1x3x8x128xf32, #tpu.memory_space<vmem>>, vector<1x1x8x128xf32>
    %11 = vector.shape_cast %10 : vector<1x1x8x128xf32> to vector<8x128xf32>
    %c0_9 = arith.constant 0 : index
    %c2 = arith.constant 2 : index
    %c0_10 = arith.constant 0 : index
    %c0_11 = arith.constant 0 : index
    %12 = vector.load %arg3[%c0_9, %c2, %c0_10, %c0_11] : memref<1x3x8x128xf32, #tpu.memory_space<vmem>>, vector<1x1x8x128xf32>
    %13 = vector.shape_cast %12 : vector<1x1x8x128xf32> to vector<8x128xf32>
    %14 = vector.extract_strided_slice %1 {offsets = [0, 0], sizes = [8, 128], strides = [1, 1]} : vector<8x512xf32> to vector<8x128xf32>
    %15 = arith.mulf %14, %9 : vector<8x128xf32>
    %16 = vector.extract_strided_slice %4 {offsets = [0, 0], sizes = [8, 128], strides = [1, 1]} : vector<8x512xf32> to vector<8x128xf32>
    %17 = arith.mulf %16, %11 : vector<8x128xf32>
    %18 = arith.addf %15, %17 : vector<8x128xf32>
    %19 = vector.extract_strided_slice %7 {offsets = [0, 0], sizes = [8, 128], strides = [1, 1]} : vector<8x512xf32> to vector<8x128xf32>
    %20 = arith.mulf %19, %13 : vector<8x128xf32>
    %21 = arith.addf %18, %20 : vector<8x128xf32>
    %c0_12 = arith.constant 0 : index
    %c0_13 = arith.constant 0 : index
    %c0_14 = arith.constant 0 : index
    %22 = vector.load %arg4[%c0_12, %c0_13, %c0_14] : memref<1x8x512xf32, #tpu.memory_space<vmem>>, vector<1x8x128xf32>
    %23 = vector.shape_cast %22 : vector<1x8x128xf32> to vector<8x128xf32>
    %24 = vector.shape_cast %21 : vector<8x128xf32> to vector<1x8x128xf32>
    tpu.vector_store %arg4[%c0_12, %c0_13, %c0_14], %24 {strides = array<i32>} : memref<1x8x512xf32, #tpu.memory_space<vmem>>, vector<1x8x128xf32>,
    %25 = vector.extract_strided_slice %1 {offsets = [0, 128], sizes = [8, 128], strides = [1, 1]} : vector<8x512xf32> to vector<8x128xf32>
    %26 = arith.mulf %25, %9 : vector<8x128xf32>
    %27 = vector.extract_strided_slice %4 {offsets = [0, 128], sizes = [8, 128], strides = [1, 1]} : vector<8x512xf32> to vector<8x128xf32>
    %28 = arith.mulf %27, %11 : vector<8x128xf32>
    %29 = arith.addf %26, %28 : vector<8x128xf32>
    %30 = vector.extract_strided_slice %7 {offsets = [0, 128], sizes = [8, 128], strides = [1, 1]} : vector<8x512xf32> to vector<8x128xf32>
    %31 = arith.mulf %30, %13 : vector<8x128xf32>
    %32 = arith.addf %29, %31 : vector<8x128xf32>
    %c0_15 = arith.constant 0 : index
    %c0_16 = arith.constant 0 : index
    %c128 = arith.constant 128 : index
    %33 = vector.load %arg4[%c0_15, %c0_16, %c128] : memref<1x8x512xf32, #tpu.memory_space<vmem>>, vector<1x8x128xf32>
    %34 = vector.shape_cast %33 : vector<1x8x128xf32> to vector<8x128xf32>
    %35 = vector.shape_cast %32 : vector<8x128xf32> to vector<1x8x128xf32>
    tpu.vector_store %arg4[%c0_15, %c0_16, %c128], %35 {strides = array<i32>} : memref<1x8x512xf32, #tpu.memory_space<vmem>>, vector<1x8x128xf32>,
    %36 = vector.extract_strided_slice %1 {offsets = [0, 256], sizes = [8, 128], strides = [1, 1]} : vector<8x512xf32> to vector<8x128xf32>
    %37 = arith.mulf %36, %9 : vector<8x128xf32>
    %38 = vector.extract_strided_slice %4 {offsets = [0, 256], sizes = [8, 128], strides = [1, 1]} : vector<8x512xf32> to vector<8x128xf32>
    %39 = arith.mulf %38, %11 : vector<8x128xf32>
    %40 = arith.addf %37, %39 : vector<8x128xf32>
    %41 = vector.extract_strided_slice %7 {offsets = [0, 256], sizes = [8, 128], strides = [1, 1]} : vector<8x512xf32> to vector<8x128xf32>
    %42 = arith.mulf %41, %13 : vector<8x128xf32>
    %43 = arith.addf %40, %42 : vector<8x128xf32>
    %c0_17 = arith.constant 0 : index
    %c0_18 = arith.constant 0 : index
    %c256 = arith.constant 256 : index
    %44 = vector.load %arg4[%c0_17, %c0_18, %c256] : memref<1x8x512xf32, #tpu.memory_space<vmem>>, vector<1x8x128xf32>
    %45 = vector.shape_cast %44 : vector<1x8x128xf32> to vector<8x128xf32>
    %46 = vector.shape_cast %43 : vector<8x128xf32> to vector<1x8x128xf32>
    tpu.vector_store %arg4[%c0_17, %c0_18, %c256], %46 {strides = array<i32>} : memref<1x8x512xf32, #tpu.memory_space<vmem>>, vector<1x8x128xf32>,
    %47 = vector.extract_strided_slice %1 {offsets = [0, 384], sizes = [8, 128], strides = [1, 1]} : vector<8x512xf32> to vector<8x128xf32>
    %48 = arith.mulf %47, %9 : vector<8x128xf32>
    %49 = vector.extract_strided_slice %4 {offsets = [0, 384], sizes = [8, 128], strides = [1, 1]} : vector<8x512xf32> to vector<8x128xf32>
    %50 = arith.mulf %49, %11 : vector<8x128xf32>
    %51 = arith.addf %48, %50 : vector<8x128xf32>
    %52 = vector.extract_strided_slice %7 {offsets = [0, 384], sizes = [8, 128], strides = [1, 1]} : vector<8x512xf32> to vector<8x128xf32>
    %53 = arith.mulf %52, %13 : vector<8x128xf32>
    %54 = arith.addf %51, %53 : vector<8x128xf32>
    %c0_19 = arith.constant 0 : index
    %c0_20 = arith.constant 0 : index
    %c384 = arith.constant 384 : index
    %55 = vector.load %arg4[%c0_19, %c0_20, %c384] : memref<1x8x512xf32, #tpu.memory_space<vmem>>, vector<1x8x128xf32>
    %56 = vector.shape_cast %55 : vector<1x8x128xf32> to vector<8x128xf32>
    %57 = vector.shape_cast %54 : vector<8x128xf32> to vector<1x8x128xf32>
    tpu.vector_store %arg4[%c0_19, %c0_20, %c384], %57 {strides = array<i32>} : memref<1x8x512xf32, #tpu.memory_space<vmem>>, vector<1x8x128xf32>,
    return
  }
  func.func @transform_0(%arg0: i32, %arg1: i32) -> (i32, i32, i32) {
    %c0_i32 = arith.constant 0 : i32
    %c0_i32_0 = arith.constant 0 : i32
    return %arg1, %arg0, %c0_i32 : i32, i32, i32
  }
  func.func @transform_1(%arg0: i32, %arg1: i32) -> (i32, i32, i32, i32) {
    %c0_i32 = arith.constant 0 : i32
    %c0_i32_0 = arith.constant 0 : i32
    %c0_i32_1 = arith.constant 0 : i32
    %c0_i32_2 = arith.constant 0 : i32
    return %c0_i32, %c0_i32_0, %arg0, %c0_i32_1 : i32, i32, i32, i32
  }
  func.func @transform_2(%arg0: i32, %arg1: i32) -> (i32, i32, i32) {
    %c0_i32 = arith.constant 0 : i32
    %c0_i32_0 = arith.constant 0 : i32
    return %arg1, %arg0, %c0_i32 : i32, i32, i32
  }
}

</mosaic_0001>

<bundles_post_ra>
// kernel: tpu_custom_call.1
= control target key start
LH: loop header
LB: loop body
LE: loop exit
PB: predicated region body
PF: predicated region fallthrough
CT: control target
= control target key end

     0   :  { %7 = vsyncpa [#allocation3], 0  ;;  %s872_s0 = inlined_call_operand.hbm [shape: f32[2,8,512], index: 0, kind: input, shape index: {}]   ;;  %s873_s1 = inlined_call_operand.hbm [shape: f32[1,3,8,128], index: 1, kind: input, shape index: {}]   ;;  %s874_s2 = inlined_call_operand.hbm [shape: f32[2,8,512], index: 2, kind: output, shape index: {}]  }
   0x1   :  { %9 = vsyncpa [#allocation3 + $0x1], 0 }
   0x2   :  { %10 = vsyncpa [#allocation6], 0 }
   0x3   :  { %11 = vsyncpa [#allocation4], 0 }
   0x4   :  { %13 = vsyncpa [#allocation4 + $0x1], 0  ;;  %s650_s9 = smov 0   ;;  %s652_s10 = smov 0  }
   0x5   :  { %s654_s11 = smov 0   ;;  %s656_s12 = smov 0  }
   0x6   :  { %s658_s13 = smov 0   ;;  %s660_s14 = smov 0  }
   0x7 LB: > { %s386_s15 = sadd.s32 4294967295, %s626_s14   ;;  %s387_s16 = sadd.s32 4294967294, %s626_s14   ;;  %s626_s14 = sphi %s660_s14, %s19_s14   ;;  %s622_s13 = sphi %s658_s13, %s898_s13   ;;  %s618_s12 = sphi %s656_s12, %s897_s12   ;;  %s614_s11 = sphi %s654_s11, %s896_s11   ;;  %s610_s10 = sphi %s652_s10, %s895_s10   ;;  %s606_s9 = sphi %s650_s9, %s894_s9  }
   0x8   : > { %p53_p0 = scmp.ne.s32.totalorder %s610_s10, %s606_s9  ;;  %p684_p1 = scmp.eq.s32.totalorder %s386_s15, 0 }
   0x9   : > { %p688_p2 = scmp.eq.s32.totalorder %s386_s15, 1  ;;  %p111_p3 = scmp.eq.s32.totalorder %s387_s16, 1 }
   0xa   : > { %s879_s17 = scalar_select %p684_p1, 1, 0 }
   0xb   : > { %s880_s18 = scalar_select %p688_p2, 1, 0 }
   0xc   : > { %p694_p4 = por %p684_p1, %p53_p0  ;;  %p388_p5 = scmp.ge.s32.totalorder %s626_s14, 1 }
   0xd   : > { %p699_p6 = por %p111_p3, %p53_p0  ;;  %p118_p7 = scmp.lt.s32.totalorder %s626_s14, 3 }
   0xe   : > { %s881_s19 = scalar_select %p694_p4, 1, 0 }
   0xf   : > { %s882_s20 = scalar_select %p699_p6, 1, 0 }
  0x10   : > { %p704_p8 = pnand %p388_p5, %p118_p7  ;;  %s628_s22 = smov [#allocation5]  }
  0x11   : > { %s132_s23 = sshll.u32 %s628_s22, 4  ;;  %s28_s25 = sadd.s32 1, %s622_s13  ;;  %s133_s23 = int_to_ptr.vmem [resolvable:$true] %s132_s23 }
  0x12   : > { %s883_s21 = scalar_select %p704_p8, 1, 0 }
  0x13   : > { %p413_p9 = pneg %p704_p8  ;;  %s482_s28 = scalar_lea.hbm %s873_s1, 384 }
  0x14   : > { %p483_p12 = scmp.ne.s32.totalorder %s873_s1, %s482_s28  ;;  %p489_p5 = scmp.lt.u32.totalorder %s482_s28, %s873_s1 }
  0x15   : > { %p713_p11 = pnand %p413_p9, %p684_p1 }
  0x17   : > { %p484_p13 = pneg %p713_p11 }
  0x19   : > { %p485_p0 = pnand %p484_p13, %p483_p12 }
  0x1b   : > { %p486_p3 = pneg %p485_p0 }
  0x1d   : > { %p491_p7 = pnand %p489_p5, %p486_p3 }
  0x1f   : > { %494 = shalt.err (!%p491_p7)
}
  0x20   : > { %s495_s5 = scalar_lea.vmem %s133_s23, 384  ;;  %p503_p1 = scmp.lt.s32.totalorder %s133_s23, %s133_s23 }
  0x21   : > { %p496_p9 = scmp.ne.s32.totalorder %s133_s23, %s495_s5  ;;  %p504_p4 = scmp.lt.s32.totalorder %s495_s5, %s495_s5 }
  0x23   : > { %p498_p10 = pnand %p496_p9, %p484_p13  ;;  %p505_p8 = por %p504_p4, %p503_p1 }
  0x25   : > { %p499_p6 = pneg %p498_p10 }
  0x27   : > { %p506_p2 = pnand %p505_p8, %p499_p6 }
  0x29   : > { %509 = shalt.err (!%p506_p2)
}
  0x2a   : > { %s629_s6 = smov 128   ;;  %s630_s7 = smov 8  }
  0x2b   : > { %416 = dma.hbm_to_vmem [thread:$0]  (!%p713_p11), %s873_s1, 384, %s133_s23, [#allocation6], %s629_s6, %s629_s6, %s630_s7  }
  0x2c   : > { %p29_p1 = scmp.ge.s32.totalorder %s28_s25, 2  ;;  %s40_s16 = sadd.s32 1, %s614_s11 }
  0x2d   : > { %p47_p2 = scmp.ne.s32.totalorder %s614_s11, %s610_s10  ;;  %p48_p4 = scmp.eq.s32.totalorder %s626_s14, 0 }
  0x2e   : > { %s900_s25 = smov (%p29_p1, %s28_s25), 0  ;;  %p886_p8 = scmp.ne.s32.totalorder %s880_s18, 0 }
  0x2f   : > { %p740_p6 = por %p48_p4, %p47_p2  ;;  %s35_s24 = ssub.s32 %s622_s13, %s900_s25 }
  0x30   : > { %p746_p10 = por %p886_p8, %p47_p2  ;;  %p426_p12 = scmp.lt.s32.totalorder %s626_s14, 2 }
  0x31   : > { %p38_p11 = scmp.eq.s32.totalorder %s35_s24, 0  ;;  %s146_s23 = sand.u32 1, %s614_s11  }
  0x32   : > { %s391_s27 = sshll.u32 %s146_s23, 5  ;;  %s403_s29 = sshll.u32 %s622_s13, 9 }
  0x33   : > { %s755_s28 = scalar_select %p38_p11, %s614_s11, %s40_s16  }
  0x34   : > { %s761_s4 = scalar_lea.hbm %s872_s0, %s403_s29  ;;  %s150_s18 = scalar_lea.vmem [#allocation2], %s391_s27 }
  0x35   : > { %s160_s5 = sshll.u32 %s150_s18, 4  ;;  %p767_p13 = pnand %p426_p12, %p740_p6  ;;  %s763_s5 = int_to_ptr.vmem [resolvable:$true] %s160_s5 }
  0x36   : > { %s147_s7 = scalar_lea.sflag [#allocation3], %s146_s23  ;;  %s510_s8 = scalar_lea.hbm %s761_s4, 512 }
  0x37   : > { %p511_p0 = scmp.ne.s32.totalorder %s761_s4, %s510_s8  ;;  %p512_p3 = pneg %p767_p13 }
  0x38   : > { %s515_s24 = scalar_lea.hbm %s872_s0, 1024  ;;  %p516_p9 = scmp.lt.u32.totalorder %s761_s4, %s872_s0 }
  0x39   : > { %p513_p5 = pnand %p512_p3, %p511_p0  ;;  %p517_p1 = scmp.lt.u32.totalorder %s515_s24, %s510_s8 }
  0x3a   : > { %p519_p4 = scmp.lt.u32.totalorder %s510_s8, %s761_s4 }
  0x3b   : > { %p514_p7 = pneg %p513_p5  ;;  %p518_p2 = por %p517_p1, %p516_p9 }
  0x3d   : > { %p520_p6 = por %p519_p4, %p518_p2 }
  0x3f   : > { %p521_p8 = pnand %p520_p6, %p514_p7 }
  0x41   : > { %524 = shalt.err (!%p521_p8)
}
  0x42   : > { %s525_s23 = scalar_lea.vmem %s763_s5, 512  ;;  %s631_s29 = smov [#allocation2]  }
  0x43   : > { %p526_p12 = scmp.ne.s32.totalorder %s763_s5, %s525_s23  ;;  %s530_s30 = sshll.u32 %s631_s29, 4  ;;  %s531_s30 = int_to_ptr.vmem [resolvable:$false] %s530_s30 }
  0x44   : > { %s532_s3 = scalar_lea.vmem %s531_s30, 1024  ;;  %p533_p5 = scmp.lt.s32.totalorder %s763_s5, %s531_s30 }
  0x45   : > { %p528_p11 = pnand %p526_p12, %p512_p3  ;;  %p534_p9 = scmp.lt.s32.totalorder %s532_s3, %s525_s23 }
  0x47   : > { %p529_p0 = pneg %p528_p11  ;;  %p535_p1 = por %p534_p9, %p533_p5 }
  0x49   : > { %p536_p2 = pnand %p535_p1, %p529_p0 }
  0x4b   : > { %539 = shalt.err (!%p536_p2)
}
  0x4c   : > { %420 = dma.hbm_to_vmem [thread:$0]  (!%p767_p13), %s761_s4, 512, %s763_s5, %s147_s7  }
  0x4d   : > { %p889_p7 = scmp.ne.s32.totalorder %s883_s21, 0 }
  0x4e   : > { %s799_s18 = sand.u32 (!%p889_p7), 1, %s610_s10   ;;  %p890_p3 = scmp.ne.s32.totalorder (!%p889_p7), %s881_s19, 0 }
  0x4f   : > { %169 = sbr.rel (%p889_p7) target bundleno = 238 (0xee), region = 28  ;;  %s395_s8 = sshll.u32 (!%p889_p7), %s799_s18, 5 }
  0x50   : > { %s172_s15 = scalar_lea.sflag (!%p889_p7), [#allocation3], %s799_s18  ;;  %s175_s16 = scalar_lea.vmem (!%p889_p7), [#allocation2], %s395_s8 }
  0x56   : > { %593 = dma.done.wait (%p890_p3), %s172_s15, 512  }
  0x57   : > { %595 = vsyncadd (%p890_p3), %s172_s15, 4294966784  ;;  %p891_p13 = scmp.ne.s32.totalorder %s879_s17, 0 }
  0x59   : > { %597 = dma.done.wait (%p891_p13), [#allocation6], 384  }
  0x5a   : > { %599 = vsyncadd (%p891_p13), [#allocation6], 4294966912  ;;  %v202_v0 = vld [vmem:[%s175_s16 + $0x10] sm:$0xff]  ;;  %v200_v1 = vld [vmem:[%s175_s16] sm:$0xff]  ;;  %s632_s21 = smov 127   ;;  %s633_s4 = smov 1  }
  0x5b   : > { %212 = vrot.lane.b32.xlu1 %v202_v0, %s632_s21  ;;  %208 = vrot.lane.b32.xlu0 %v200_v1, %s632_s21  ;;  %v203_v2 = vld [vmem:[%s175_s16 + $0x18] sm:$0xff]  ;;  %v201_v3 = vld [vmem:[%s175_s16 + $0x8] sm:$0xff]  ;;  %vm216_vm0 = vcmask 1039360   ;;  %v244_v6 = vld [vmem:[#allocation5] sm:$0xff]  ;;  %vm235_vm1 = vcmask 7168   ;;  %s404_s17 = sshll.u32 %s618_s12, 9 }
  0x5c   : > { %v246_v7 = vld [vmem:[#allocation5 + $0x8] sm:$0xff]  ;;  %v249_v12 = vmul.f32 %v244_v6, %v200_v1  ;;  %v248_v16 = vld [vmem:[#allocation5 + $0x10] sm:$0xff]  ;;  %v261_v17 = vmul.f32 %v244_v6, %v202_v0  ;;  %v267_v21 = vmul.f32 %v244_v6, %v203_v2  ;;  %v255_v24 = vmul.f32 %v244_v6, %v201_v3  ;;  %s199_s19 = scalar_lea.vmem [#allocation7], %s395_s8  ;;  %s823_s24 = scalar_lea.hbm %s874_s2, %s404_s17 }
  0x5d   : > { %s290_s5 = sshll.u32 %s199_s19, 4  ;;  %s274_s12 = scalar_lea.sflag [#allocation4], %s799_s18  ;;  %s825_s5 = int_to_ptr.vmem [resolvable:$true] %s290_s5 }
  0x5e   : > { %s540_s22 = scalar_lea.vmem %s825_s5, 512  ;;  %s634_s27 = smov [#allocation7]  }
  0x5f   : > { %214 = vrot.lane.b32.xlu1 %v203_v2, %s632_s21  ;;  %210 = vrot.lane.b32.xlu0 %v201_v3, %s632_s21  ;;  %p541_p4 = scmp.ne.s32.totalorder %s825_s5, %s540_s22  ;;  %s544_s23 = sshll.u32 %s634_s27, 4  ;;  %s545_s23 = int_to_ptr.vmem [resolvable:$false] %s544_s23 }
  0x60   : > { %s546_s29 = scalar_lea.vmem %s545_s23, 1024  ;;  %p547_p12 = scmp.lt.s32.totalorder %s825_s5, %s545_s23 }
  0x61   : > { %p542_p6 = pnand %p541_p4, %p746_p10  ;;  %p548_p11 = scmp.lt.s32.totalorder %s546_s29, %s540_s22 }
  0x63   : > { %229 = vrot.lane.b32.xlu1 %v200_v1, %s633_s4  ;;  %226 = vrot.lane.b32.xlu0 %v203_v2, %s633_s4  ;;  %p543_p8 = pneg %p542_p6  ;;  %p549_p0 = por %p548_p11, %p547_p12 }
  0x65   : > { %p550_p5 = pnand %p549_p0, %p543_p8 }
  0x67   : > { %233 = vrot.lane.b32.xlu1 %v202_v0, %s633_s4  ;;  %231 = vrot.lane.b32.xlu0 %v201_v3, %s633_s4 }
  0xcd   : > { %v213_v4 = vpop.permute.xlu1 %212  ;;  %v209_v5 = vpop.permute.xlu0 %208 }
  0xd1   : > { %v215_v8 = vpop.permute.xlu1 %214  ;;  %v211_v9 = vpop.permute.xlu0 %210 }
  0xd2   : > { %v219_v10 = vsel %vm216_vm0, %v213_v4, %v215_v8  ;;  %v217_v11 = vsel %vm216_vm0, %v209_v5, %v211_v9  ;;  %v225_v13 = vsel %vm216_vm0, %v215_v8, %v209_v5  ;;  %v218_v15 = vsel %vm216_vm0, %v211_v9, %v213_v4 }
  0xd3   : > { %v250_v14 = vmul.f32 %v246_v7, %v217_v11  ;;  %v262_v18 = vmul.f32 %v246_v7, %v219_v10  ;;  %v268_v22 = vmul.f32 %v246_v7, %v225_v13  ;;  %v256_v26 = vmul.f32 %v246_v7, %v218_v15 }
  0xd5   : > { %v230_v19 = vpop.permute.xlu1 %229  ;;  %v227_v20 = vpop.permute.xlu0 %226  ;;  %v251_v25 = vadd.f32 %v250_v14, %v249_v12  ;;  %v263_v28 = vadd.f32 %v262_v18, %v261_v17  ;;  %v269_v32 = vadd.f32 %v268_v22, %v267_v21  ;;  %v257_v36 = vadd.f32 %v256_v26, %v255_v24 }
  0xd6   : > { %v243_v23 = vsel %vm235_vm1, %v227_v20, %v230_v19 }
  0xd7   : > { %v252_v27 = vmul.f32 %v248_v16, %v243_v23 }
  0xd9   : > { %v253_v29 = vadd.f32 %v252_v27, %v251_v25  ;;  %v234_v30 = vpop.permute.xlu1 %233  ;;  %v232_v31 = vpop.permute.xlu0 %231 }
  0xda   : > { %v238_v33 = vsel %vm235_vm1, %v234_v30, %v227_v20  ;;  %v236_v34 = vsel %vm235_vm1, %v230_v19, %v232_v31  ;;  %v237_v35 = vsel %vm235_vm1, %v232_v31, %v234_v30 }
  0xdb   : > { %254 = vst [vmem:[%s199_s19] sm:$0xff] %v253_v29  ;;  %v270_v37 = vmul.f32 %v248_v16, %v238_v33  ;;  %v258_v38 = vmul.f32 %v248_v16, %v236_v34  ;;  %v264_v39 = vmul.f32 %v248_v16, %v237_v35 }
  0xdd   : > { %v271_v40 = vadd.f32 %v270_v37, %v269_v32  ;;  %v259_v41 = vadd.f32 %v258_v38, %v257_v36  ;;  %v265_v42 = vadd.f32 %v264_v39, %v263_v28 }
  0xdf   : > { %272 = vst [vmem:[%s199_s19 + $0x18] sm:$0xff] %v271_v40  ;;  %260 = vst [vmem:[%s199_s19 + $0x8] sm:$0xff] %v259_v41 }
  0xe0   : > { %266 = vst [vmem:[%s199_s19 + $0x10] sm:$0xff] %v265_v42 }
  0xe1   : > { %553 = shalt.err (!%p550_p5)
}
  0xe2   : > { %s554_s30 = scalar_lea.hbm %s823_s24, 512  ;;  %s558_s8 = scalar_lea.hbm %s874_s2, 1024 }
  0xe3   : > { %p555_p9 = scmp.ne.s32.totalorder %s823_s24, %s554_s30  ;;  %p559_p7 = scmp.lt.u32.totalorder %s823_s24, %s874_s2 }
  0xe4   : > { %p560_p3 = scmp.lt.u32.totalorder %s558_s8, %s554_s30  ;;  %p562_p4 = scmp.lt.u32.totalorder %s554_s30, %s823_s24 }
  0xe5   : > { %p556_p1 = pnand %p555_p9, %p746_p10 }
  0xe6   : > { %p561_p13 = por %p560_p3, %p559_p7 }
  0xe7   : > { %p557_p2 = pneg %p556_p1 }
  0xe8   : > { %p563_p6 = por %p562_p4, %p561_p13 }
  0xea   : > { %p564_p8 = pnand %p563_p6, %p557_p2 }
  0xec   : > { %567 = shalt.err (!%p564_p8)
}
  0xed   : > { %411 = dma.vmem_to_hbm [thread:$0]  (%p746_p10), %s825_s5, 512, %s823_s24, %s274_s12  }
  0xee PF: > { %s302_s21 = sand.u32 1, %s606_s9   ;;  %p892_p12 = scmp.ne.s32.totalorder %s882_s20, 0 }
  0xef   : > { %p893_p11 = scmp.ge.s32.totalorder %s626_s14, 2  ;;  %s303_s4 = scalar_lea.sflag [#allocation4], %s302_s21 }
  0xf1   : > { %p422_p0 = pnand %p893_p11, %p892_p12 }
  0xf3   : > { %601 = dma.done.wait (!%p422_p0), %s303_s4, 512  }
  0xf4   : > { %603 = vsyncadd (!%p422_p0), %s303_s4, 4294966784  ;;  %s19_s14 = sadd.s32 1, %s626_s14   ;;  %s894_s9 = smov %s610_s10 }
  0xf5   : > { %p16_p5 = scmp.ge.s32.totalorder %s19_s14, 4   ;;  %s895_s10 = smov %s614_s11 }
  0xf6   : > { %s896_s11 = smov %s755_s28  ;;  %s897_s12 = smov %s622_s13 }
  0xf7   : > { %s898_s13 = smov %s900_s25  ;;  %18 = sbr.rel (!%p16_p5) target bundleno = 7 (0x7), region = 80 }
  0xfe   :  { %308 = vsyncpa [#allocation3], 1 }
  0xff   :  { %310 = vsyncpa [#allocation3 + $0x1], 1 }
 0x100   :  { %311 = vsyncpa [#allocation6], 1 }
 0x101   :  { %312 = vsyncpa [#allocation4], 1 }
 0x102   :  { %314 = vsyncpa [#allocation4 + $0x1], 1 }

</bundles_post_ra>
